<compile_context>
chip_gen: v7x
topology: tpu7x:2x2x1
jax: 0.10.0
libtpu: 0.0.40
codegen_flags: <defaults>
</compile_context>

<pallas_src>
import functools

import jax
import jax.numpy as jnp
from jax import lax
from jax.experimental import pallas as pl
from jax.experimental.pallas import tpu as pltpu


def _kl_freebits_kernel(p_ref, q_ref, part_ref, *, cats, n_packed, num_steps):
    """One grid step: KL partial sum of a (tile, width) slab of lane-packed logits."""
    i = pl.program_id(0)

    # Per-tile cast keeps HBM traffic at the caller's dtype; all math runs in f32.
    p = p_ref[...].astype(jnp.float32)          # (TR, W)
    q = q_ref[...].astype(jnp.float32)          # (TR, W)
    tr, width = p.shape

    # Shared per-packed-row shift.  KL(p||q) below is algebraically exact for ANY
    # shift; using the row max (instead of a per-32-lane-group max) only assumes the
    # max-logit spread across the <=4 distributions sharing a row stays < ~80, which
    # holds for any realistic network logits, and avoids 10 XLU rolls per element.
    p_shift = p - jnp.max(p, axis=-1, keepdims=True)
    q_shift = q - jnp.max(q, axis=-1, keepdims=True)

    exp_p = jnp.exp(p_shift)
    exp_q = jnp.exp(q_shift)
    w = exp_p * (p_shift - q_shift)

    # Constant block-diagonal all-ones matrix for segmented sums (one 32-lane block
    # per packed distribution).  Built from iotas: when packing is active, `cats`
    # divides 128, so "same block" == (row ^ col) < cats (power-of-two block size).
    if width == cats:
        seg = jnp.ones((width, width), jnp.float32)
    else:
        ri = lax.broadcasted_iota(jnp.int32, (width, width), 0)
        ci = lax.broadcasted_iota(jnp.int32, (width, width), 1)
        seg = ((ri ^ ci) < cats).astype(jnp.float32)

    # MXU segmented sums; result is each group's sum broadcast across its lanes.
    sum_p = jnp.dot(exp_p, seg, preferred_element_type=jnp.float32)
    sum_q = jnp.dot(exp_q, seg, preferred_element_type=jnp.float32)
    sum_w = jnp.dot(w, seg, preferred_element_type=jnp.float32)

    # KL(group) = E_p[p_shift - q_shift] - log(sum_p) + log(sum_q)
    #           = sum_w / sum_p + log(sum_q / sum_p)        (one log instead of two)
    inv_p = pl.reciprocal(sum_p, approx=True)
    inv_p = inv_p * (jnp.float32(2.0) - sum_p * inv_p)      # one Newton step -> ~f32 exact
    kl = sum_w * inv_p + jnp.log(sum_q * inv_p)             # (TR, W), value repeated per group

    scale = jnp.float32(1.0 / cats)                         # each group replicated `cats` times

    def _write(total):
        part_ref[...] = jnp.full(part_ref.shape, total, jnp.float32)

    if n_packed % tr != 0:
        # Tail masking only on the final (partial) block; all other steps skip it.
        n_valid_last = n_packed - (num_steps - 1) * tr

        @pl.when(i == num_steps - 1)
        def _tail():
            rows = lax.broadcasted_iota(jnp.int32, (tr, 1), 0)
            masked = jnp.where(rows < n_valid_last, kl, jnp.float32(0.0))
            _write(jnp.sum(masked) * scale)

        @pl.when(i != num_steps - 1)
        def _body():
            _write(jnp.sum(kl) * scale)
    else:
        _write(jnp.sum(kl) * scale)


def _choose_row_tile(n_packed, width, in_bytes):
    """Largest packed-row tile that keeps inputs (x2 pipeline buffers) + ~6 f32
    temporaries within ~20 MiB of VMEM (safe on v7x's 64 MiB; plenty on v5e/v6e)."""
    bytes_per_row = 2 * 2 * width * in_bytes + 6 * width * 4
    budget = 20 * 1024 * 1024
    tile = max(8, min(8192, (budget // bytes_per_row) // 8 * 8))
    if n_packed <= tile:
        # Single block covering all rows: block dim == full array dim is always legal.
        return n_packed
    return tile


def categorical_kl_free_bits(p_logits, q_logits, free_bits):
    """Pallas implementation of CategoricalKLDivLossWithFreeBits.forward."""
    assert p_logits.shape == q_logits.shape
    B, L, D, C = p_logits.shape
    n_rows = B * L * D

    # Lane packing: put `group = 128 // C` whole distributions side by side on the
    # 128-lane axis.  The reshape is free (row-major contiguous).  Fall back to one
    # distribution per row if C does not tile the lane axis.
    if C <= 128 and 128 % C == 0 and n_rows % (128 // C) == 0:
        group = 128 // C
    else:
        group = 1
    width = group * C
    n_packed = n_rows // group

    p2 = p_logits.reshape(n_packed, width)
    q2 = q_logits.reshape(n_packed, width)

    in_bytes = jnp.dtype(p_logits.dtype).itemsize
    tile = _choose_row_tile(n_packed, width, in_bytes)
    num_steps = pl.cdiv(n_packed, tile)

    kernel = functools.partial(
        _kl_freebits_kernel, cats=C, n_packed=n_packed, num_steps=num_steps)

    cost = pl.CostEstimate(
        flops=int(8 * n_rows * C + 6 * n_rows * C * width),
        transcendentals=int(2 * n_rows * C + 2 * n_rows),
        bytes_accessed=int(2 * n_rows * C * in_bytes + num_steps * 8 * 128 * 4),
    )

    partials = pl.pallas_call(
        kernel,
        out_shape=jax.ShapeDtypeStruct((num_steps, 8, 128), jnp.float32),
        grid_spec=pltpu.PrefetchScalarGridSpec(
            num_scalar_prefetch=0,
            grid=(num_steps,),
            in_specs=[
                pl.BlockSpec((tile, width), lambda i: (i, 0)),
                pl.BlockSpec((tile, width), lambda i: (i, 0)),
            ],
            out_specs=pl.BlockSpec((1, 8, 128), lambda i: (i, 0, 0)),
        ),
        compiler_params=pltpu.CompilerParams(
            # No carried state: each step is independent, so v7x can split the grid
            # across both TensorCores; neutral on single-TC v5e/v6e.
            dimension_semantics=("parallel",),
            vmem_limit_bytes=40 * 1024 * 1024,
        ),
        cost_estimate=cost,
    )(p2, q2)

    # Tiny JAX epilogue: sum per-step partials, mean over (B, L), free-bits clamp.
    real_kl_div = jnp.sum(partials[:, 0, 0]) * jnp.float32(1.0 / (B * L))
    kl_div = jnp.maximum(jnp.float32(free_bits), real_kl_div)
    return kl_div, real_kl_div


def _reference(p_logits, q_logits, free_bits):
    log_p = jax.nn.log_softmax(p_logits.astype(jnp.float32), axis=-1)
    log_q = jax.nn.log_softmax(q_logits.astype(jnp.float32), axis=-1)
    kl = jnp.sum(jnp.exp(log_p) * (log_p - log_q), axis=-1)   # (B, L, D)
    kl = jnp.sum(kl, axis=-1)                                  # (B, L)
    real_kl = jnp.mean(kl)
    return jnp.maximum(jnp.float32(free_bits), real_kl), real_kl


if __name__ == "__main__":
    free_bits = 1.0
    key = jax.random.PRNGKey(0)

    # Small shapes consistent with the module: B=2, L=8, D=4 latent vars, C=32 categories.
    B, L, D, C = 2, 8, 4, 32
    kp, kq, kbig = jax.random.split(key, 3)
    p_logits = jax.random.normal(kp, (B, L, D, C), dtype=jnp.float32)
    q_logits = jax.random.normal(kq, (B, L, D, C), dtype=jnp.float32) * 0.5 + 0.1

    kl_div, real_kl_div = categorical_kl_free_bits(p_logits, q_logits, free_bits)
    jax.block_until_ready((kl_div, real_kl_div))
    ref_kl, ref_real = _reference(p_logits, q_logits, free_bits)
    assert jnp.allclose(real_kl_div, ref_real, atol=5e-3, rtol=5e-3), (real_kl_div, ref_real)
    assert jnp.allclose(kl_div, ref_kl, atol=5e-3, rtol=5e-3), (kl_div, ref_kl)

    # Free-bits clamp actually binding.
    kl_hi, real_hi = categorical_kl_free_bits(p_logits, q_logits, 1000.0)
    jax.block_until_ready((kl_hi, real_hi))
    assert float(kl_hi) == 1000.0, kl_hi
    assert jnp.allclose(real_hi, ref_real, atol=5e-3, rtol=5e-3), (real_hi, ref_real)

    # Larger case: multi-step grid, per-step parallel partials, masked partial tail
    # (N = 4*129*32 = 16512 rows -> 4128 packed rows, tile = 4096 -> 2 steps).
    B2, L2, D2, C2 = 4, 129, 32, 32
    kp2, kq2 = jax.random.split(kbig)
    p_big = jax.random.normal(kp2, (B2, L2, D2, C2), dtype=jnp.float32)
    q_big = jax.random.normal(kq2, (B2, L2, D2, C2), dtype=jnp.float32) * 0.7 - 0.2
    kl_big, real_big = categorical_kl_free_bits(p_big, q_big, free_bits)
    jax.block_until_ready((kl_big, real_big))
    ref_kl_big, ref_real_big = _reference(p_big, q_big, free_bits)
    assert jnp.allclose(real_big, ref_real_big, atol=5e-3, rtol=5e-3), (real_big, ref_real_big)
    assert jnp.allclose(kl_big, ref_kl_big, atol=5e-3, rtol=5e-3), (kl_big, ref_kl_big)

    # bf16 logits path: kernel streams bf16 tiles (half the HBM traffic), math in f32.
    p_bf16 = p_logits.astype(jnp.bfloat16)
    q_bf16 = q_logits.astype(jnp.bfloat16)
    kl_bf, real_bf = categorical_kl_free_bits(p_bf16, q_bf16, free_bits)
    jax.block_until_ready((kl_bf, real_bf))
    ref_kl_bf, ref_real_bf = _reference(p_bf16.astype(jnp.float32),
                                        q_bf16.astype(jnp.float32), free_bits)
    assert jnp.allclose(real_bf, ref_real_bf, atol=5e-3, rtol=5e-3), (real_bf, ref_real_bf)
    assert jnp.allclose(kl_bf, ref_kl_bf, atol=5e-3, rtol=5e-3), (kl_bf, ref_kl_bf)

    print("KERNEL_OK")
</pallas_src>

<mosaic_0001>
module attributes {stable_mosaic.version = 11 : i64} {
  func.func @_kl_freebits_kernel(%arg0: i32, %arg1: memref<16x128xf32, #tpu.memory_space<vmem>>, %arg2: memref<16x128xf32, #tpu.memory_space<vmem>>, %arg3: memref<1x8x128xf32, #tpu.memory_space<vmem>>) attributes {dimension_semantics = [#tpu.dimension_semantics<parallel>], iteration_bounds = array<i64: 1>, scalar_prefetch = 0 : i64, scratch_operands = 0 : i64, tpu.core_type = #tpu.core_type<tc>, window_params = [{transform_indices = @transform_0, window_bounds = array<i64: 16, 128>}, {transform_indices = @transform_1, window_bounds = array<i64: 16, 128>}, {transform_indices = @transform_2, window_bounds = array<i64: 1, 8, 128>}]} {
    %c0 = arith.constant 0 : index
    %c0_0 = arith.constant 0 : index
    %0 = vector.load %arg1[%c0, %c0_0] : memref<16x128xf32, #tpu.memory_space<vmem>>, vector<16x128xf32>
    %c0_1 = arith.constant 0 : index
    %c0_2 = arith.constant 0 : index
    %1 = vector.load %arg2[%c0_1, %c0_2] : memref<16x128xf32, #tpu.memory_space<vmem>>, vector<16x128xf32>
    %cst = arith.constant dense<0xFF800000> : vector<16xf32>
    %2 = vector.multi_reduction <maximumf>, %0, %cst [1] : vector<16x128xf32> to vector<16xf32>
    %3 = vector.shape_cast %2 : vector<16xf32> to vector<16x1xf32>
    %4 = vector.broadcast %3 : vector<16x1xf32> to vector<16x128xf32>
    %5 = arith.subf %0, %4 : vector<16x128xf32>
    %cst_3 = arith.constant dense<0xFF800000> : vector<16xf32>
    %6 = vector.multi_reduction <maximumf>, %1, %cst_3 [1] : vector<16x128xf32> to vector<16xf32>
    %7 = vector.shape_cast %6 : vector<16xf32> to vector<16x1xf32>
    %8 = vector.broadcast %7 : vector<16x1xf32> to vector<16x128xf32>
    %9 = arith.subf %1, %8 : vector<16x128xf32>
    %10 = math.exp %5 : vector<16x128xf32>
    %11 = math.exp %9 : vector<16x128xf32>
    %12 = arith.subf %5, %9 : vector<16x128xf32>
    %13 = arith.mulf %10, %12 : vector<16x128xf32>
    %14 = tpu.iota {dimensions = array<i32: 0>} : vector<128x128xi32>
    %15 = tpu.iota {dimensions = array<i32: 1>} : vector<128x128xi32>
    %16 = arith.xori %14, %15 : vector<128x128xi32>
    %c32_i32 = arith.constant 32 : i32
    %17 = vector.broadcast %c32_i32 : i32 to vector<128x128xi32>
    %18 = arith.cmpi slt, %16, %17 : vector<128x128xi32>
    %19 = arith.extui %18 : vector<128x128xi1> to vector<128x128xi32>
    %20 = arith.sitofp %19 : vector<128x128xi32> to vector<128x128xf32>
    %cst_4 = arith.constant dense<0.000000e+00> : vector<16x128xf32>
    %21 = tpu.matmul %10, %20, %cst_4 {dimension_numbers = #tpu.dot_dimension_numbers<[1], [0], [0], [1], [0, 0, 1, 1], [], []>} : vector<16x128xf32>, vector<128x128xf32>, vector<16x128xf32> -> vector<16x128xf32>
    %cst_5 = arith.constant dense<0.000000e+00> : vector<16x128xf32>
    %22 = tpu.matmul %11, %20, %cst_5 {dimension_numbers = #tpu.dot_dimension_numbers<[1], [0], [0], [1], [0, 0, 1, 1], [], []>} : vector<16x128xf32>, vector<128x128xf32>, vector<16x128xf32> -> vector<16x128xf32>
    %cst_6 = arith.constant dense<0.000000e+00> : vector<16x128xf32>
    %23 = tpu.matmul %13, %20, %cst_6 {dimension_numbers = #tpu.dot_dimension_numbers<[1], [0], [0], [1], [0, 0, 1, 1], [], []>} : vector<16x128xf32>, vector<128x128xf32>, vector<16x128xf32> -> vector<16x128xf32>
    %24 = tpu.reciprocal %21 {approx = true} : vector<16x128xf32> -> vector<16x128xf32>
    %25 = arith.mulf %21, %24 : vector<16x128xf32>
    %cst_7 = arith.constant 2.000000e+00 : f32
    %26 = vector.broadcast %cst_7 : f32 to vector<16x128xf32>
    %27 = arith.subf %26, %25 : vector<16x128xf32>
    %28 = arith.mulf %24, %27 : vector<16x128xf32>
    %29 = arith.mulf %23, %28 : vector<16x128xf32>
    %30 = arith.mulf %22, %28 : vector<16x128xf32>
    %31 = math.log %30 : vector<16x128xf32>
    %32 = arith.addf %29, %31 : vector<16x128xf32>
    %33 = vector.shape_cast %32 : vector<16x128xf32> to vector<1x16x128xf32>
    %cst_8 = arith.constant dense<0.000000e+00> : vector<1xf32>
    %34 = vector.multi_reduction <add>, %33, %cst_8 [1, 2] : vector<1x16x128xf32> to vector<1xf32>
    %35 = vector.shape_cast %34 : vector<1xf32> to vector<1x1x1xf32>
    %36 = vector.extract %35[0, 0, 0] : f32 from vector<1x1x1xf32>
    %cst_9 = arith.constant 3.125000e-02 : f32
    %37 = arith.mulf %36, %cst_9 : f32
    %38 = vector.broadcast %37 : f32 to vector<1x8x128xf32>
    %c0_10 = arith.constant 0 : index
    %c0_11 = arith.constant 0 : index
    %c0_12 = arith.constant 0 : index
    %39 = vector.load %arg3[%c0_10, %c0_11, %c0_12] : memref<1x8x128xf32, #tpu.memory_space<vmem>>, vector<1x8x128xf32>
    tpu.vector_store %arg3[%c0_10, %c0_11, %c0_12], %38 {strides = array<i32>} : memref<1x8x128xf32, #tpu.memory_space<vmem>>, vector<1x8x128xf32>,
    return
  }
  func.func @transform_0(%arg0: i32) -> (i32, i32) {
    %c0_i32 = arith.constant 0 : i32
    %c0_i32_0 = arith.constant 0 : i32
    return %arg0, %c0_i32 : i32, i32
  }
  func.func @transform_1(%arg0: i32) -> (i32, i32) {
    %c0_i32 = arith.constant 0 : i32
    %c0_i32_0 = arith.constant 0 : i32
    return %arg0, %c0_i32 : i32, i32
  }
  func.func @transform_2(%arg0: i32) -> (i32, i32, i32) {
    %c0_i32 = arith.constant 0 : i32
    %c0_i32_0 = arith.constant 0 : i32
    %c0_i32_1 = arith.constant 0 : i32
    return %arg0, %c0_i32, %c0_i32_0 : i32, i32, i32
  }
}

</mosaic_0001>

<bundles_post_ra>
// kernel: tpu_custom_call.1
= control target key start
LH: loop header
LB: loop body
LE: loop exit
PB: predicated region body
PF: predicated region fallthrough
CT: control target
= control target key end

     0   :  { %7 = vsyncpa [#allocation3], 0  ;;  %s1123_s0 = inlined_call_operand.hbm [shape: f32[16,128], index: 0, kind: input, shape index: {}]   ;;  %s1124_s1 = inlined_call_operand.hbm [shape: f32[16,128], index: 1, kind: input, shape index: {}]   ;;  %s1125_s2 = inlined_call_operand.hbm [shape: f32[1,8,128], index: 2, kind: output, shape index: {}]  }
   0x1   :  { %8 = vsyncpa [#allocation6], 0 }
   0x2   :  { %9 = vsyncpa [#allocation4], 0  ;;  %s838_s9 = smov [#allocation2]   ;;  %s766_s13 = scalar_lea.hbm %s1123_s0, 256 }
   0x3   :  { %s15_s10 = sshll.u32 %s838_s9, 4  ;;  %p767_p0 = scmp.ne.s32.totalorder %s1123_s0, %s766_s13  ;;  %s16_s10 = int_to_ptr.vmem [resolvable:$true] %s15_s10 }
   0x4   :  { %p770_p1 = scmp.lt.u32.totalorder %s766_s13, %s1123_s0 }
   0x6   :  { %p772_p2 = pnand %p770_p1, %p767_p0 }
   0x8   :  { %775 = shalt.err (!%p772_p2)
}
   0x9   :  { %s776_s18 = scalar_lea.vmem %s16_s10, 256  ;;  %p781_p4 = scmp.lt.s32.totalorder %s16_s10, %s16_s10 }
   0xa   :  { %p777_p3 = scmp.ne.s32.totalorder %s16_s10, %s776_s18  ;;  %p782_p5 = scmp.lt.s32.totalorder %s776_s18, %s776_s18 }
   0xc   :  { %p783_p6 = por %p782_p5, %p781_p4 }
   0xe   :  { %p784_p7 = pnand %p783_p6, %p777_p3 }
  0x10   :  { %787 = shalt.err (!%p784_p7)
}
  0x11   :  { %s839_s19 = smov 128   ;;  %s840_s20 = smov 8  }
  0x12   :  { %21 = dma.hbm_to_vmem [thread:$0]  %s1123_s0, 256, %s16_s10, [#allocation3], %s839_s19, %s839_s19, %s840_s20  }
  0x13   :  { %s841_s23 = smov [#allocation5]   ;;  %s788_s27 = scalar_lea.hbm %s1124_s1, 256 }
  0x14   :  { %s27_s24 = sshll.u32 %s841_s23, 4  ;;  %p789_p8 = scmp.ne.s32.totalorder %s1124_s1, %s788_s27  ;;  %s28_s24 = int_to_ptr.vmem [resolvable:$true] %s27_s24 }
  0x15   :  { %p792_p9 = scmp.lt.u32.totalorder %s788_s27, %s1124_s1 }
  0x17   :  { %p794_p10 = pnand %p792_p9, %p789_p8 }
  0x19   :  { %797 = shalt.err (!%p794_p10)
}
  0x1a   :  { %s798_s4 = scalar_lea.vmem %s28_s24, 256  ;;  %p803_p12 = scmp.lt.s32.totalorder %s28_s24, %s28_s24 }
  0x1b   :  { %p799_p11 = scmp.ne.s32.totalorder %s28_s24, %s798_s4  ;;  %p804_p13 = scmp.lt.s32.totalorder %s798_s4, %s798_s4 }
  0x1d   :  { %p805_p0 = por %p804_p13, %p803_p12 }
  0x1f   :  { %p806_p1 = pnand %p805_p0, %p799_p11 }
  0x21   :  { %809 = shalt.err (!%p806_p1)
}
  0x22   :  { %33 = dma.hbm_to_vmem [thread:$0]  %s1124_s1, 256, %s28_s24, [#allocation6], %s839_s19, %s839_s19, %s840_s20  }
  0x23   :  { %832 = dma.done.wait [#allocation3], 256  }
  0x24   :  { %833 = vsyncadd [#allocation3], 4294967040 }
  0x25   :  { %834 = dma.done.wait [#allocation6], 256  }
  0x26   :  { %835 = vsyncadd [#allocation6], 4294967040  ;;  %v68_v0 = vlaneseq  ;;  %v899_v14 = vld [vmem:[#allocation5] sm:$0xff]  ;;  %v901_v15 = vld [vmem:[#allocation2] sm:$0xff]  ;;  %v842_v21 = vmov 1.0|1.0  }
  0x27   :  { %50 = vmax.xlane.f32.xlu1 %v899_v14  ;;  %44 = vmax.xlane.f32.xlu0 %v901_v15  ;;  %v907_v18 = vld [vmem:[#allocation5 + $0x8] sm:$0xff]  ;;  %v909_v19 = vld [vmem:[#allocation2 + $0x8] sm:$0xff]  ;;  %s843_s1 = smov [#allocation7]  }
  0x28   :  { %v883_v1 = vshrl.u32 %v68_v0, 7  ;;  %v885_v2 = vand.u32 127, %v68_v0  ;;  %s413_s6 = sshll.u32 %s843_s1, 4  ;;  %s414_s6 = int_to_ptr.vmem [resolvable:$true] %s413_s6 }
  0x29   :  { %s810_s9 = scalar_lea.vmem %s414_s6, 128  ;;  %p815_p3 = scmp.lt.s32.totalorder %s414_s6, %s414_s6 }
  0x2a   :  { %v70_v3 = vadd.s32 8, %v883_v1  ;;  %v87_v4 = vxor.u32 %v885_v2, %v883_v1  ;;  %v71_v5 = vadd.s32 16, %v883_v1  ;;  %v72_v6 = vadd.s32 24, %v883_v1  ;;  %p811_p2 = scmp.ne.s32.totalorder %s414_s6, %s810_s9  ;;  %p816_p4 = scmp.lt.s32.totalorder %s810_s9, %s810_s9 }
  0x2b   :  { %v73_v7 = vadd.s32 32, %v883_v1  ;;  %v74_v8 = vadd.s32 40, %v883_v1  ;;  %v75_v9 = vadd.s32 48, %v883_v1  ;;  %v76_v10 = vadd.s32 56, %v883_v1  ;;  %52 = vmax.xlane.f32.xlu1 %v907_v18  ;;  %46 = vmax.xlane.f32.xlu0 %v909_v19 }
  0x2c   :  { %v88_v11 = vxor.u32 %v885_v2, %v70_v3  ;;  %vm103_vm0 = vcmp.lt.s32.totalorder %v87_v4, 32  ;;  %v89_v12 = vxor.u32 %v885_v2, %v71_v5  ;;  %v90_v13 = vxor.u32 %v885_v2, %v72_v6  ;;  %p817_p5 = por %p816_p4, %p815_p3 }
  0x2d   :  { %v91_v16 = vxor.u32 %v885_v2, %v73_v7  ;;  %v92_v17 = vxor.u32 %v885_v2, %v74_v8  ;;  %v93_v23 = vxor.u32 %v885_v2, %v75_v9  ;;  %v94_v24 = vxor.u32 %v885_v2, %v76_v10 }
  0x2e   :  { %vm104_vm1 = vcmp.lt.s32.totalorder %v88_v11, 32  ;;  %vm105_vm2 = vcmp.lt.s32.totalorder %v89_v12, 32  ;;  %vm106_vm3 = vcmp.lt.s32.totalorder %v90_v13, 32  ;;  %v77_v27 = vadd.s32 64, %v883_v1  ;;  %p818_p6 = pnand %p817_p5, %p811_p2 }
  0x2f   :  { %vm911_vm4 = vmpackc.low %vm104_vm1, %vm103_vm0  ;;  %vm107_vm6 = vcmp.lt.s32.totalorder %v91_v16, 32  ;;  %vm108_vm7 = vcmp.lt.s32.totalorder %v92_v17, 32  ;;  %vm109_vm9 = vcmp.lt.s32.totalorder %v93_v23, 32  ;;  %vm110_vm10 = vcmp.lt.s32.totalorder %v94_v24, 32 }
  0x30   :  { %647 = vmatprep.subr.msk.bf16.mxu0 %vm911_vm4, %v842_v21  ;;  %vm918_vm5 = vmpackc.low %vm106_vm3, %vm105_vm2  ;;  %679 = vmatprep.subr.msk.bf16.mxu1 %vm911_vm4, %v842_v21  ;;  %v78_v28 = vadd.s32 72, %v883_v1  ;;  %v95_v29 = vxor.u32 %v885_v2, %v77_v27  ;;  %v79_v32 = vadd.s32 80, %v883_v1  ;;  %v80_v33 = vadd.s32 88, %v883_v1 }
  0x31   :  { %649 = vmatpush3.bf16.msk.msra.mxu0 %vm911_vm4, %v842_v21  ;;  %681 = vmatpush3.bf16.msk.msra.mxu1 %vm911_vm4, %v842_v21  ;;  %vm938_vm8 = vmpackc.low %vm108_vm7, %vm107_vm6  ;;  %v81_v36 = vadd.s32 96, %v883_v1  ;;  %v82_v37 = vadd.s32 104, %v883_v1  ;;  %v83_v41 = vadd.s32 112, %v883_v1  ;;  %v84_v42 = vadd.s32 120, %v883_v1 }
  0x32   :  { %651 = vmatprep.subr.msk.bf16.mxu0 %vm918_vm5, %v842_v21  ;;  %683 = vmatprep.subr.msk.bf16.mxu1 %vm918_vm5, %v842_v21  ;;  %vm957_vm11 = vmpackc.low %vm110_vm10, %vm109_vm9  ;;  %v96_v30 = vxor.u32 %v885_v2, %v78_v28  ;;  %vm111_vm12 = vcmp.lt.s32.totalorder %v95_v29, 32  ;;  %v97_v34 = vxor.u32 %v885_v2, %v79_v32  ;;  %v98_v35 = vxor.u32 %v885_v2, %v80_v33 }
  0x33   :  { %v99_v39 = vxor.u32 %v885_v2, %v81_v36  ;;  %v100_v40 = vxor.u32 %v885_v2, %v82_v37  ;;  %v101_v44 = vxor.u32 %v885_v2, %v83_v41  ;;  %v102_v45 = vxor.u32 %v885_v2, %v84_v42 }
  0x34   :  { %vm112_vm13 = vcmp.lt.s32.totalorder %v96_v30, 32  ;;  %vm113_vm15 = vcmp.lt.s32.totalorder %v97_v34, 32  ;;  %vm114_vm0 = vcmp.lt.s32.totalorder %v98_v35, 32 }
  0x35   :  { %653 = vmatpush3.bf16.msk.msra.mxu0 %vm918_vm5, %v842_v21  ;;  %685 = vmatpush3.bf16.msk.msra.mxu1 %vm918_vm5, %v842_v21  ;;  %vm980_vm14 = vmpackc.low %vm112_vm13, %vm111_vm12  ;;  %vm115_vm2 = vcmp.lt.s32.totalorder %v99_v39, 32  ;;  %vm116_vm3 = vcmp.lt.s32.totalorder %v100_v40, 32  ;;  %vm117_vm7 = vcmp.lt.s32.totalorder %v101_v44, 32  ;;  %vm118_vm9 = vcmp.lt.s32.totalorder %v102_v45, 32 }
  0x36   :  { %655 = vmatprep.subr.msk.bf16.mxu0 %vm938_vm8, %v842_v21  ;;  %687 = vmatprep.subr.msk.bf16.mxu1 %vm938_vm8, %v842_v21  ;;  %vm1005_vm1 = vmpackc.low %vm114_vm0, %vm113_vm15 }
  0x37   :  { %vm1025_vm6 = vmpackc.low %vm116_vm3, %vm115_vm2 }
  0x38   :  { %vm1043_vm10 = vmpackc.low %vm118_vm9, %vm117_vm7 }
  0x39   :  { %657 = vmatpush3.bf16.msk.msra.mxu0 %vm938_vm8, %v842_v21  ;;  %689 = vmatpush3.bf16.msk.msra.mxu1 %vm938_vm8, %v842_v21 }
  0x3a   :  { %659 = vmatprep.subr.msk.bf16.mxu0 %vm957_vm11, %v842_v21  ;;  %691 = vmatprep.subr.msk.bf16.mxu1 %vm957_vm11, %v842_v21 }
  0x3d   :  { %661 = vmatpush3.bf16.msk.msra.mxu0 %vm957_vm11, %v842_v21  ;;  %693 = vmatpush3.bf16.msk.msra.mxu1 %vm957_vm11, %v842_v21 }
  0x3e   :  { %663 = vmatprep.subr.msk.bf16.mxu0 %vm980_vm14, %v842_v21  ;;  %695 = vmatprep.subr.msk.bf16.mxu1 %vm980_vm14, %v842_v21 }
  0x41   :  { %665 = vmatpush3.bf16.msk.msra.mxu0 %vm980_vm14, %v842_v21  ;;  %697 = vmatpush3.bf16.msk.msra.mxu1 %vm980_vm14, %v842_v21 }
  0x42   :  { %667 = vmatprep.subr.msk.bf16.mxu0 %vm1005_vm1, %v842_v21  ;;  %699 = vmatprep.subr.msk.bf16.mxu1 %vm1005_vm1, %v842_v21 }
  0x45   :  { %669 = vmatpush3.bf16.msk.msra.mxu0 %vm1005_vm1, %v842_v21  ;;  %701 = vmatpush3.bf16.msk.msra.mxu1 %vm1005_vm1, %v842_v21 }
  0x46   :  { %671 = vmatprep.subr.msk.bf16.mxu0 %vm1025_vm6, %v842_v21  ;;  %703 = vmatprep.subr.msk.bf16.mxu1 %vm1025_vm6, %v842_v21 }
  0x49   :  { %673 = vmatpush3.bf16.msk.msra.mxu0 %vm1025_vm6, %v842_v21  ;;  %705 = vmatpush3.bf16.msk.msra.mxu1 %vm1025_vm6, %v842_v21 }
  0x4a   :  { %675 = vmatprep.subr.msk.bf16.mxu0 %vm1043_vm10, %v842_v21  ;;  %707 = vmatprep.subr.msk.bf16.mxu1 %vm1043_vm10, %v842_v21 }
  0x4d   :  { %677 = vmatpush3.bf16.msk.msra.mxu0 %vm1043_vm10, %v842_v21  ;;  %709 = vmatpush3.bf16.msk.msra.mxu1 %vm1043_vm10, %v842_v21 }
  0x4e   :  { %711 = vmatprep.subr.msk.bf16.mxu0 %vm911_vm4, %v842_v21 }
  0xb4   :  { %v51_v47 = vpop.xlane.xlu1 %50  ;;  %v45_v48 = vpop.xlane.xlu0 %44 }
  0xb5   :  { %v54_v49 = vsub.f32 %v899_v14, %v51_v47  ;;  %v48_v50 = vsub.f32 %v901_v15, %v45_v48 }
  0xb7   :  { %v60_v51 = vmul.f32 1.442695, %v54_v49  ;;  %v56_v52 = vmul.f32 1.442695, %v48_v50  ;;  %v64_v61 = vsub.f32 %v48_v50, %v54_v49 }
  0xb8   :  { %v53_v53 = vpop.xlane.xlu1 %52  ;;  %v47_v54 = vpop.xlane.xlu0 %46 }
  0xb9   :  { %750 = vpow2.f32 %v56_v52  ;;  %v55_v55 = vsub.f32 %v907_v18, %v53_v53  ;;  %v49_v56 = vsub.f32 %v909_v19, %v47_v54 }
  0xba   :  { %752 = vpow2.f32 %v60_v51 }
  0xbb   :  { %v62_v57 = vmul.f32 1.442695, %v55_v55  ;;  %v58_v58 = vmul.f32 1.442695, %v49_v56  ;;  %v65_v1 = vsub.f32 %v49_v56, %v55_v55 }
  0xbd   :  { %754 = vpow2.f32 %v62_v57 }
  0xbe   :  { %756 = vpow2.f32 %v58_v58 }
  0xc3   :  { %v751_v59 = vpop.eup %750 }
  0xc4   :  { %v753_v60 = vpop.eup %752  ;;  %573 = vmatprep.mubr.f32.mxu0 %v751_v59  ;;  %v66_v0 = vmul.f32 %v751_v59, %v64_v61 }
  0xc5   :  { %608 = vmatprep.mubr.f32.mxu1 %v753_v60 }
  0xc7   :  { %v755_v62 = vpop.eup %754 }
  0xc8   :  { %v757_v63 = vpop.eup %756  ;;  %609 = vmatmul.mubr.f32.vlgmr.msra.gmra.mrb[0].mxu1 %v755_v62 }
  0xc9   :  { %574 = vmatmul.mubr.f32.vlgmr.msra.gmra.mrb[0].mxu0 %v757_v63  ;;  %v67_v2 = vmul.f32 %v757_v63, %v65_v1 }
  0xca   :  { %713 = vmatpush3.bf16.msk.msra.mxu0 %vm911_vm4, %v842_v21  ;;  %643 = vmatprep.mubr.f32.mxu0 %v66_v0 }
  0xcb   :  { %715 = vmatprep.subr.msk.bf16.mxu0 %vm918_vm5, %v842_v21 }
  0xce   :  { %717 = vmatpush3.bf16.msk.msra.mxu0 %vm918_vm5, %v842_v21 }
  0xcf   :  { %719 = vmatprep.subr.msk.bf16.mxu0 %vm938_vm8, %v842_v21 }
  0xd2   :  { %721 = vmatpush3.bf16.msk.msra.mxu0 %vm938_vm8, %v842_v21 }
  0xd3   :  { %723 = vmatprep.subr.msk.bf16.mxu0 %vm957_vm11, %v842_v21 }
  0xd6   :  { %725 = vmatpush3.bf16.msk.msra.mxu0 %vm957_vm11, %v842_v21 }
  0xd7   :  { %727 = vmatprep.subr.msk.bf16.mxu0 %vm980_vm14, %v842_v21 }
  0xda   :  { %729 = vmatpush3.bf16.msk.msra.mxu0 %vm980_vm14, %v842_v21 }
  0xdb   :  { %731 = vmatprep.subr.msk.bf16.mxu0 %vm1005_vm1, %v842_v21 }
  0xde   :  { %733 = vmatpush3.bf16.msk.msra.mxu0 %vm1005_vm1, %v842_v21 }
  0xdf   :  { %735 = vmatprep.subr.msk.bf16.mxu0 %vm1025_vm6, %v842_v21 }
  0xe2   :  { %737 = vmatpush3.bf16.msk.msra.mxu0 %vm1025_vm6, %v842_v21 }
  0xe3   :  { %739 = vmatprep.subr.msk.bf16.mxu0 %vm1043_vm10, %v842_v21 }
  0xe6   :  { %741 = vmatpush3.bf16.msk.msra.mxu0 %vm1043_vm10, %v842_v21 }
  0xe9   :  { %644 = vmatmul.mubr.f32.vlgmr.msra.gmra.mrb[2].mxu0 %v67_v2 }
 0x19b   :  { %v610_v3 = vpop.f32.mrb[0].mxu1 }
 0x19c   :  { %v575_v4 = vpop.f32.mrb[0].mxu0  ;;  %v292_v5 = vpop.f32.mrb[1].mxu1 }
 0x19d   :  { %758 = vrcp.f32 %v575_v4  ;;  %v217_v6 = vpop.f32.mrb[1].mxu0 }
 0x19e   :  { %760 = vrcp.f32 %v217_v6 }
 0x1a7   :  { %v759_v7 = vpop.eup %758 }
 0x1a8   :  { %v761_v8 = vpop.eup %760  ;;  %v379_v9 = vmul.f32 %v759_v7, %v575_v4 }
 0x1a9   :  { %v378_v10 = vmul.f32 %v761_v8, %v217_v6 }
 0x1aa   :  { %v381_v11 = vsub.f32 2.0, %v379_v9 }
 0x1ab   :  { %v380_v12 = vsub.f32 2.0, %v378_v10 }
 0x1ac   :  { %v383_v13 = vmul.f32 %v759_v7, %v381_v11 }
 0x1ad   :  { %v382_v14 = vmul.f32 %v761_v8, %v380_v12 }
 0x1ae   :  { %v387_v15 = vmul.f32 %v610_v3, %v383_v13 }
 0x1af   :  { %v386_v16 = vmul.f32 %v382_v14, %v292_v5 }
 0x1b0   :  { %762 = vlog2.f32 %v387_v15 }
 0x1b1   :  { %764 = vlog2.f32 %v386_v16 }
 0x1ba   :  { %v763_v17 = vpop.eup %762 }
 0x1bb   :  { %v765_v18 = vpop.eup %764  ;;  %v391_v19 = vmul.f32 0.6931472, %v763_v17 }
 0x1bc   :  { %v389_v20 = vmul.f32 0.6931472, %v765_v18  ;;  %v645_v21 = vpop.f32.mrb[2].mxu0 }
 0x1bd   :  { %v385_v22 = vmul.f32 %v645_v21, %v383_v13  ;;  %v367_v23 = vpop.f32.mrb[3].mxu0 }
 0x1be   :  { %v384_v24 = vmul.f32 %v382_v14, %v367_v23 }
 0x1bf   :  { %v393_v25 = vadd.f32 %v391_v19, %v385_v22 }
 0x1c0   :  { %v392_v26 = vadd.f32 %v389_v20, %v384_v24 }
 0x1c2   :  { %v394_v27 = vadd.f32 %v393_v25, %v392_v26 }
 0x1c4   :  { %395 = vadd.xlane.f32.xlu0 %v394_v27 }
 0x251   :  { %v396_v28 = vpop.xlane.xlu0 %395 }
 0x252   :  { %v397_v29 = vrot.slane %v396_v28, 4 }
 0x254   :  { %v398_v30 = vadd.f32 %v397_v29, %v396_v28 }
 0x256   :  { %v399_v31 = vrot.slane %v398_v30, 2 }
 0x258   :  { %v400_v32 = vadd.f32 %v399_v31, %v398_v30 }
 0x25a   :  { %v401_v33 = vrot.slane %v400_v32, 1 }
 0x25c   :  { %v402_v34 = vadd.f32 %v401_v33, %v400_v32 }
 0x25e   :  { %742 = vpush %v402_v34 }
 0x28f   :  { %s743_s7 = spop %742 }
 0x290   :  { %s404_s8 = smul.f32 0.03125, %s743_s7 }
 0x292   :  { %v405_v35 = vstv %s404_s8 }
 0x293   :  { %406 = vst [vmem:[#allocation7] sm:$0xff] %v405_v35 }
 0x294   :  { %821 = shalt.err (!%p818_p6)
}
 0x295   :  { %s822_s12 = scalar_lea.hbm %s1125_s2, 128 }
 0x296   :  { %p823_p7 = scmp.ne.s32.totalorder %s1125_s2, %s822_s12  ;;  %p826_p8 = scmp.lt.u32.totalorder %s822_s12, %s1125_s2 }
 0x298   :  { %p828_p9 = pnand %p826_p8, %p823_p7 }
 0x29a   :  { %831 = shalt.err (!%p828_p9)
}
 0x29b   :  { %416 = dma.vmem_to_hbm [thread:$0]  %s414_s6, 128, %s1125_s2, [#allocation4]  }
 0x29c   :  { %836 = dma.done.wait [#allocation4], 128  }
 0x29d   :  { %837 = vsyncadd [#allocation4], 4294967168 }
 0x29e   :  { %420 = vsyncpa [#allocation3], 1 }
 0x29f   :  { %421 = vsyncpa [#allocation6], 1 }
 0x2a0   :  { %422 = vsyncpa [#allocation4], 1 }

</bundles_post_ra>
